<compile_context>
chip_gen: v6e
topology: v6e:2x2x1
jax: 0.10.0
libtpu: 0.0.40
codegen_flags: <defaults>
</compile_context>

<pallas_src>
import functools

import numpy as np
import jax
import jax.numpy as jnp
from jax.experimental import pallas as pl
from jax.experimental.pallas import tpu as pltpu


def _row_block(P):
    """Row-block size for the sim/logits grid: 256 feeds the 2x256x256 MXU
    on v6e/v7x; 128 otherwise (fine on v5e's 4x128x128 MXU / tiny inputs)."""
    return 256 if P % 256 == 0 else 128


def _vmem_limit_bytes():
    """~75% of this generation's VMEM (128 MiB v5e/v6e, 64 MiB v7x) so blocks
    plus double-buffering keep explicit headroom on every chip."""
    try:
        cap = int(pltpu.get_tpu_info().vmem_capacity_bytes)
    except Exception:
        cap = 64 * 1024 * 1024  # conservative (v7x per-core VMEM)
    return (3 * cap) // 4


# ---------------------------------------------------------------------------
# Pass A: normalize rows, fold 1/sqrt(T), emit bf16 MXU operands.
# ---------------------------------------------------------------------------
def _prep_kernel(z_ref, out_ref, *, inv_sqrt_t):
    x = z_ref[...].astype(jnp.float32)
    ssq = jnp.sum(x * x, axis=1, keepdims=True)
    # F.normalize(dim=1): x / max(||x||, 1e-12) == x * rsqrt(max(ssq, 1e-24)).
    scale = inv_sqrt_t * jax.lax.rsqrt(jnp.maximum(ssq, 1e-24))
    out_ref[...] = (x * scale).astype(jnp.bfloat16)


def _prepare_operands(z1, z2, temperature):
    """Stack z1/z2, zero-pad to P = round_up(2n, 128) rows, normalize and
    scale by 1/sqrt(T), return bf16 (P, d) operands for the sim matmul."""
    n, d = z1.shape
    N = 2 * n
    P = pl.cdiv(N, 128) * 128
    z = jnp.concatenate([z1.astype(jnp.float32), z2.astype(jnp.float32)], axis=0)
    if P > N:
        z = jnp.pad(z, ((0, P - N), (0, 0)))
    tm = _row_block(P)
    return pl.pallas_call(
        functools.partial(_prep_kernel,
                          inv_sqrt_t=float(1.0 / np.sqrt(temperature))),
        out_shape=jax.ShapeDtypeStruct((P, d), jnp.bfloat16),
        grid=(P // tm,),
        in_specs=[pl.BlockSpec((tm, d), lambda i: (i, 0))],
        out_specs=pl.BlockSpec((tm, d), lambda i: (i, 0)),
        compiler_params=pltpu.CompilerParams(
            dimension_semantics=("parallel",)),
    )(z)


# ---------------------------------------------------------------------------
# Pass B: per row-block, sim slab on the MXU then roll+select into logits.
#   logits[r, 0] = sim[r, partner(r)]                            (one-hot)
#   logits[r, c] = sim[r, (c-1) + [c-1>=a] + [c-1>=a+n-1]], c>=1, a = r mod n
# which is exactly a {-1, 0, +1} lane shift relative to column c.
# ---------------------------------------------------------------------------
def _sim_logits_kernel(z_ref, out_ref, *, n, block_rows):
    i = pl.program_id(0)
    P = z_ref.shape[0]

    start = pl.multiple_of(i * block_rows, block_rows)
    zl = z_ref[pl.ds(start, block_rows), :]      # (TM, d) bf16 LHS rows
    zr = z_ref[...]                              # (P, d) bf16, VMEM-resident

    # sim[r, c] = <z_r, z_c>; cosine/T already folded into the operands.
    sim = jax.lax.dot_general(                   # (TM, P) f32, bf16 MXU
        zl, zr, (((1,), (1,)), ((), ())),
        preferred_element_type=jnp.float32)

    row = (jax.lax.broadcasted_iota(jnp.int32, (block_rows, P), 0)
           + i * block_rows)                     # global row index
    col = jax.lax.broadcasted_iota(jnp.int32, (block_rows, P), 1)
    a = row % n                                  # min(row, partner(row))
    partner = jnp.where(row < n, row + n, row - n)

    # Positive pair similarity via one-hot lane reduction (XLU).
    pos = jnp.sum(jnp.where(col == partner, sim, 0.0), axis=1, keepdims=True)

    # Negatives: two static lane rolls of sim, selected per row (XLU slot).
    sim_m1 = pltpu.roll(sim, 1, axis=1)          # sim[r, c-1]
    sim_p1 = pltpu.roll(sim, P - 1, axis=1)      # sim[r, c+1]
    m1 = col >= a + 1                            # c-1 >= a
    m2 = col >= a + n                            # c-1 >= a + n - 1
    neg = jnp.where(m2, sim_p1, jnp.where(m1, sim, sim_m1))

    out_ref[...] = jnp.where(col == 0, pos, neg)


def nt_xent_forward(z1, z2, temperature=0.5):
    n, d = z1.shape
    N = 2 * n
    P = pl.cdiv(N, 128) * 128
    tm = _row_block(P)

    zb = _prepare_operands(z1, z2, temperature)

    # TODO(synk): for very large N or d, additionally tile the RHS columns /
    # contraction dim; here the full normalized z stays VMEM-resident.
    logits_padded = pl.pallas_call(
        functools.partial(_sim_logits_kernel, n=n, block_rows=tm),
        out_shape=jax.ShapeDtypeStruct((P, P), jnp.float32),
        grid=(P // tm,),
        in_specs=[pl.BlockSpec((P, d), lambda i: (0, 0))],
        out_specs=pl.BlockSpec((tm, P), lambda i: (i, 0)),
        compiler_params=pltpu.CompilerParams(
            dimension_semantics=("parallel",),
            vmem_limit_bytes=_vmem_limit_bytes()),
    )(zb)

    logits = logits_padded[:N, :N - 1]
    # TODO(synk): PyTorch returns int64 labels; JAX default (x64 off) is int32.
    labels = jnp.zeros((N,), dtype=jnp.int32)
    return logits, labels


# ---------------------------------------------------------------------------
# References for the self-test.
# ---------------------------------------------------------------------------
def _select_logits(sim, n):
    """Mirror the PyTorch positive/negative column selection."""
    N = 2 * n
    idx = np.arange(N)
    partner = np.concatenate([idx[:n] + n, idx[n:] - n])
    positives = sim[idx, partner][:, None]
    mask = np.ones((N, N), dtype=bool)
    mask[idx, idx] = False
    mask[idx, partner] = False
    negatives = sim[mask].reshape(N, N - 2)
    return np.concatenate([positives, negatives], axis=1)


def _nt_xent_reference(z1, z2, temperature=0.5):
    """Exact (float64) mirror of the PyTorch module."""
    z1 = np.asarray(z1, np.float64)
    z2 = np.asarray(z2, np.float64)

    def norm(x):
        return x / np.maximum(np.linalg.norm(x, axis=1, keepdims=True), 1e-12)

    n = z1.shape[0]
    z = np.concatenate([norm(z1), norm(z2)], axis=0)
    sim = (z @ z.T) / temperature
    return _select_logits(sim, n), np.zeros(2 * n, dtype=np.int64)


if __name__ == "__main__":
    key = jax.random.PRNGKey(0)
    k1, k2 = jax.random.split(key)
    n, d = 8, 32  # small shapes consistent with the module's forward
    temperature = 0.5
    z1 = jax.random.normal(k1, (n, d), dtype=jnp.float32)
    z2 = jax.random.normal(k2, (n, d), dtype=jnp.float32)

    logits, labels = nt_xent_forward(z1, z2, temperature)
    logits = jax.block_until_ready(logits)
    labels = jax.block_until_ready(labels)
    logits_np = np.asarray(logits)

    # Check 1: against the exact f64 mirror of the PyTorch module; tolerance
    # sized for bf16 MXU operands (|err| <= ~2^-8 * ||a||*||b|| ~= 8e-3).
    ref_logits, ref_labels = _nt_xent_reference(z1, z2, temperature)
    np.testing.assert_allclose(logits_np, ref_logits, rtol=2e-2, atol=2e-2)

    # Check 2 (tight): same selection semantics computed from the kernel's own
    # bf16 operands -- isolates the roll/select mapping from quantization.
    zb = _prepare_operands(z1, z2, temperature)
    zb_np = np.asarray(zb.astype(jnp.float32), np.float64)[: 2 * n]
    ref_tight = _select_logits(zb_np @ zb_np.T, n)
    np.testing.assert_allclose(logits_np, ref_tight, rtol=1e-4, atol=1e-4)

    assert np.array_equal(np.asarray(labels), np.zeros(2 * n, np.int32))
    print("KERNEL_OK")
</pallas_src>

<mosaic_0001>
module attributes {stable_mosaic.version = 11 : i64} {
  func.func @_prep_kernel(%arg0: i32, %arg1: memref<128x32xf32, #tpu.memory_space<vmem>>, %arg2: memref<128x32xbf16, #tpu.memory_space<vmem>>) attributes {dimension_semantics = [#tpu.dimension_semantics<parallel>], iteration_bounds = array<i64: 1>, scalar_prefetch = 0 : i64, scratch_operands = 0 : i64, tpu.core_type = #tpu.core_type<tc>, window_params = [{transform_indices = @transform_0, window_bounds = array<i64: 128, 32>}, {transform_indices = @transform_1, window_bounds = array<i64: 128, 32>}]} {
    %c0 = arith.constant 0 : index
    %c0_0 = arith.constant 0 : index
    %0 = vector.load %arg1[%c0, %c0_0] : memref<128x32xf32, #tpu.memory_space<vmem>>, vector<128x32xf32>
    %1 = arith.mulf %0, %0 : vector<128x32xf32>
    %cst = arith.constant dense<0.000000e+00> : vector<128xf32>
    %2 = vector.multi_reduction <add>, %1, %cst [1] : vector<128x32xf32> to vector<128xf32>
    %3 = vector.shape_cast %2 : vector<128xf32> to vector<128x1xf32>
    %cst_1 = arith.constant 1.000000e-24 : f32
    %4 = vector.broadcast %cst_1 : f32 to vector<128x1xf32>
    %5 = arith.maximumf %3, %4 : vector<128x1xf32>
    %6 = math.rsqrt %5 : vector<128x1xf32>
    %cst_2 = arith.constant 1.41421354 : f32
    %7 = vector.broadcast %cst_2 : f32 to vector<128x1xf32>
    %8 = arith.mulf %7, %6 : vector<128x1xf32>
    %9 = vector.broadcast %8 : vector<128x1xf32> to vector<128x32xf32>
    %10 = arith.mulf %0, %9 : vector<128x32xf32>
    %11 = arith.truncf %10 : vector<128x32xf32> to vector<128x32xbf16>
    %c0_3 = arith.constant 0 : index
    %c0_4 = arith.constant 0 : index
    %12 = vector.load %arg2[%c0_3, %c0_4] : memref<128x32xbf16, #tpu.memory_space<vmem>>, vector<128x32xbf16>
    tpu.vector_store %arg2[%c0_3, %c0_4], %11 {strides = array<i32>} : memref<128x32xbf16, #tpu.memory_space<vmem>>, vector<128x32xbf16>,
    return
  }
  func.func @transform_0(%arg0: i32) -> (i32, i32) {
    %c0_i32 = arith.constant 0 : i32
    %c0_i32_0 = arith.constant 0 : i32
    return %arg0, %c0_i32 : i32, i32
  }
  func.func @transform_1(%arg0: i32) -> (i32, i32) {
    %c0_i32 = arith.constant 0 : i32
    %c0_i32_0 = arith.constant 0 : i32
    return %arg0, %c0_i32 : i32, i32
  }
}

</mosaic_0001>

<bundles_post_ra>
// kernel: tpu_custom_call.1
= control target key start
LH: loop header
LB: loop body
LE: loop exit
PB: predicated region body
PF: predicated region fallthrough
CT: control target
= control target key end

     0   :  { %vm40_vm0 = vcmask 261120   ;;  %vm217_vm1 = vcmask 257024   ;;  %s520_s0 = inlined_call_operand.vmem [shape: f32[128,32], index: 0, kind: input, shape index: {}]   ;;  %s521_s1 = inlined_call_operand.vmem [shape: bf16[128,32], index: 1, kind: output, shape index: {}]  }
   0x1   :  { %v315_v0 = vld [vmem:[%s520_s0 + $0x10] sm:$0xff]  ;;  %v320_v1 = vld [vmem:[%s520_s0] sm:$0xff]  ;;  %v325_v2 = vld [vmem:[%s520_s0 + $0x18] sm:$0xff] }
   0x2   :  { %v26_v3 = vmul.f32 %v315_v0, %v315_v0  ;;  %v24_v4 = vmul.f32 %v320_v1, %v320_v1  ;;  %v27_v5 = vmul.f32 %v325_v2, %v325_v2  ;;  %v336_v6 = vld [vmem:[%s520_s0 + $0x8] sm:$0xff]  ;;  %v348_v9 = vld [vmem:[%s520_s0 + $0x20] sm:$0xff]  ;;  %v361_v16 = vld [vmem:[%s520_s0 + $0x38] sm:$0xff] }
   0x3   :  { %v25_v7 = vmul.f32 %v336_v6, %v336_v6  ;;  %v343_v8 = vld [vmem:[%s520_s0 + $0x28] sm:$0xff]  ;;  %v28_v15 = vmul.f32 %v348_v9, %v348_v9  ;;  %v366_v17 = vld [vmem:[%s520_s0 + $0x30] sm:$0xff]  ;;  %v31_v20 = vmul.f32 %v361_v16, %v361_v16  ;;  %v382_v23 = vld [vmem:[%s520_s0 + $0x40] sm:$0xff] }
   0x4   :  { %v47_v10 = vsel %vm40_vm0, %v26_v3, 0.0  ;;  %v41_v11 = vsel %vm40_vm0, %v24_v4, 0.0  ;;  %v50_v12 = vsel %vm40_vm0, %v27_v5, 0.0  ;;  %v29_v14 = vmul.f32 %v343_v8, %v343_v8  ;;  %v377_v22 = vld [vmem:[%s520_s0 + $0x48] sm:$0xff]  ;;  %v393_v28 = vld [vmem:[%s520_s0 + $0x58] sm:$0xff]  ;;  %v398_v29 = vld [vmem:[%s520_s0 + $0x50] sm:$0xff] }
   0x5   :  { %48 = vadd.xlane.f32.xlu1 %v47_v10  ;;  %42 = vadd.xlane.f32.xlu0 %v41_v11  ;;  %v44_v13 = vsel %vm40_vm0, %v25_v7, 0.0  ;;  %v53_v19 = vsel %vm40_vm0, %v28_v15, 0.0  ;;  %v30_v21 = vmul.f32 %v366_v17, %v366_v17  ;;  %v62_v24 = vsel %vm40_vm0, %v31_v20, 0.0  ;;  %v409_v34 = vld [vmem:[%s520_s0 + $0x68] sm:$0xff]  ;;  %v414_v35 = vld [vmem:[%s520_s0 + $0x60] sm:$0xff]  ;;  %v425_v40 = vld [vmem:[%s520_s0 + $0x78] sm:$0xff] }
   0x6   :  { %v56_v18 = vsel %vm40_vm0, %v29_v14, 0.0  ;;  %v33_v26 = vmul.f32 %v377_v22, %v377_v22  ;;  %v32_v27 = vmul.f32 %v382_v23, %v382_v23  ;;  %v35_v32 = vmul.f32 %v393_v28, %v393_v28  ;;  %v430_v41 = vld [vmem:[%s520_s0 + $0x70] sm:$0xff] }
   0x7   :  { %v59_v25 = vsel %vm40_vm0, %v30_v21, 0.0  ;;  %v34_v33 = vmul.f32 %v398_v29, %v398_v29  ;;  %v37_v38 = vmul.f32 %v409_v34, %v409_v34  ;;  %v36_v39 = vmul.f32 %v414_v35, %v414_v35 }
   0x8   :  { %v68_v30 = vsel %vm40_vm0, %v33_v26, 0.0  ;;  %v65_v31 = vsel %vm40_vm0, %v32_v27, 0.0  ;;  %v74_v36 = vsel %vm40_vm0, %v35_v32, 0.0  ;;  %v39_v44 = vmul.f32 %v425_v40, %v425_v40 }
   0x9   :  { %51 = vadd.xlane.f32.xlu1 %v50_v12  ;;  %45 = vadd.xlane.f32.xlu0 %v44_v13  ;;  %v71_v37 = vsel %vm40_vm0, %v34_v33, 0.0  ;;  %v80_v42 = vsel %vm40_vm0, %v37_v38, 0.0  ;;  %v77_v43 = vsel %vm40_vm0, %v36_v39, 0.0  ;;  %v38_v45 = vmul.f32 %v430_v41, %v430_v41 }
   0xa   :  { %v86_v46 = vsel %vm40_vm0, %v39_v44, 0.0 }
   0xb   :  { %v83_v47 = vsel %vm40_vm0, %v38_v45, 0.0 }
   0xd   :  { %57 = vadd.xlane.f32.xlu1 %v56_v18  ;;  %54 = vadd.xlane.f32.xlu0 %v53_v19 }
  0x11   :  { %63 = vadd.xlane.f32.xlu1 %v62_v24  ;;  %60 = vadd.xlane.f32.xlu0 %v59_v25 }
  0x15   :  { %69 = vadd.xlane.f32.xlu1 %v68_v30  ;;  %66 = vadd.xlane.f32.xlu0 %v65_v31 }
  0x19   :  { %75 = vadd.xlane.f32.xlu1 %v74_v36  ;;  %72 = vadd.xlane.f32.xlu0 %v71_v37 }
  0x1d   :  { %81 = vadd.xlane.f32.xlu1 %v80_v42  ;;  %78 = vadd.xlane.f32.xlu0 %v77_v43 }
  0x21   :  { %87 = vadd.xlane.f32.xlu1 %v86_v46  ;;  %84 = vadd.xlane.f32.xlu0 %v83_v47 }
  0x8e   :  { %v49_v48 = vpop.xlane.xlu1 %48  ;;  %v43_v49 = vpop.xlane.xlu0 %42 }
  0x8f   :  { %v91_v50 = vmax.f32 %v49_v48, 1e-24  ;;  %v89_v51 = vmax.f32 %v43_v49, 1e-24 }
  0x91   :  { %270 = vrsqrt.f32 %v91_v50 }
  0x92   :  { %272 = vrsqrt.f32 %v89_v51  ;;  %v52_v52 = vpop.xlane.xlu1 %51  ;;  %v46_v53 = vpop.xlane.xlu0 %45 }
  0x93   :  { %v92_v54 = vmax.f32 %v52_v52, 1e-24  ;;  %v90_v55 = vmax.f32 %v46_v53, 1e-24 }
  0x95   :  { %274 = vrsqrt.f32 %v92_v54 }
  0x96   :  { %276 = vrsqrt.f32 %v90_v55  ;;  %v58_v56 = vpop.xlane.xlu1 %57  ;;  %v55_v57 = vpop.xlane.xlu0 %54 }
  0x97   :  { %v94_v58 = vmax.f32 %v58_v56, 1e-24  ;;  %v93_v59 = vmax.f32 %v55_v57, 1e-24 }
  0x99   :  { %278 = vrsqrt.f32 %v94_v58 }
  0x9a   :  { %280 = vrsqrt.f32 %v93_v59  ;;  %v64_v60 = vpop.xlane.xlu1 %63  ;;  %v61_v61 = vpop.xlane.xlu0 %60 }
  0x9b   :  { %v96_v62 = vmax.f32 %v64_v60, 1e-24  ;;  %v95_v63 = vmax.f32 %v61_v61, 1e-24 }
  0x9d   :  { %282 = vrsqrt.f32 %v96_v62 }
  0x9e   :  { %v271_v3 = vpop.eup %270  ;;  %284 = vrsqrt.f32 %v95_v63  ;;  %v70_v4 = vpop.xlane.xlu1 %69 }
  0x9f   :  { %v67_v5 = vpop.xlane.xlu0 %66  ;;  %v273_v7 = vpop.eup %272  ;;  %v123_v10 = vmul.f32 1.4142135, %v271_v3  ;;  %v98_v11 = vmax.f32 %v70_v4, 1e-24 }
  0xa0   :  { %v97_v12 = vmax.f32 %v67_v5, 1e-24  ;;  %v121_v13 = vmul.f32 1.4142135, %v273_v7 }
  0xa1   :  { %v139_v14 = vmul.f32 %v123_v10, %v315_v0  ;;  %286 = vrsqrt.f32 %v98_v11 }
  0xa2   :  { %v275_v15 = vpop.eup %274  ;;  %v137_v18 = vmul.f32 %v121_v13, %v320_v1  ;;  %288 = vrsqrt.f32 %v97_v12  ;;  %v76_v19 = vpop.xlane.xlu1 %75 }
  0xa3   :  { %v73_v20 = vpop.xlane.xlu0 %72  ;;  %v277_v21 = vpop.eup %276  ;;  %v256_v24 = vpack.c.bf16 %v139_v14, %v139_v14  ;;  %v124_v25 = vmul.f32 1.4142135, %v275_v15  ;;  %v100_v26 = vmax.f32 %v76_v19, 1e-24 }
  0xa4   :  { %v99_v27 = vmax.f32 %v73_v20, 1e-24  ;;  %v254_v30 = vpack.c.bf16 %v137_v18, %v137_v18  ;;  %v122_v31 = vmul.f32 1.4142135, %v277_v21 }
  0xa5   :  { %220 = vst.msk [vmem:[%s521_s1 + $0x8] sm:$0xf] %vm217_vm1, %v256_v24  ;;  %v140_v0 = vmul.f32 %v124_v25, %v325_v2  ;;  %290 = vrsqrt.f32 %v100_v26 }
  0xa6   :  { %v279_v32 = vpop.eup %278  ;;  %218 = vst.msk [vmem:[%s521_s1] sm:$0xf] %vm217_vm1, %v254_v30  ;;  %v138_v1 = vmul.f32 %v122_v31, %v336_v6  ;;  %292 = vrsqrt.f32 %v99_v27  ;;  %v82_v33 = vpop.xlane.xlu1 %81 }
  0xa7   :  { %v79_v36 = vpop.xlane.xlu0 %78  ;;  %v281_v37 = vpop.eup %280  ;;  %v257_v38 = vpack.c.bf16 %v140_v0, %v140_v0  ;;  %v126_v39 = vmul.f32 1.4142135, %v279_v32  ;;  %v102_v42 = vmax.f32 %v82_v33, 1e-24 }
  0xa8   :  { %v101_v43 = vmax.f32 %v79_v36, 1e-24  ;;  %v255_v44 = vpack.c.bf16 %v138_v1, %v138_v1  ;;  %v125_v45 = vmul.f32 1.4142135, %v281_v37 }
  0xa9   :  { %221 = vst.msk [vmem:[%s521_s1 + $0xc] sm:$0xf] %vm217_vm1, %v257_v38  ;;  %v142_v2 = vmul.f32 %v126_v39, %v343_v8  ;;  %294 = vrsqrt.f32 %v102_v42 }
  0xaa   :  { %v283_v46 = vpop.eup %282  ;;  %219 = vst.msk [vmem:[%s521_s1 + $0x4] sm:$0xf] %vm217_vm1, %v255_v44  ;;  %v141_v6 = vmul.f32 %v125_v45, %v348_v9  ;;  %296 = vrsqrt.f32 %v101_v43  ;;  %v88_v47 = vpop.xlane.xlu1 %87 }
  0xab   :  { %v85_v48 = vpop.xlane.xlu0 %84  ;;  %v285_v49 = vpop.eup %284  ;;  %v259_v50 = vpack.c.bf16 %v142_v2, %v142_v2  ;;  %v128_v51 = vmul.f32 1.4142135, %v283_v46  ;;  %v104_v52 = vmax.f32 %v88_v47, 1e-24 }
  0xac   :  { %v103_v53 = vmax.f32 %v85_v48, 1e-24  ;;  %v258_v54 = vpack.c.bf16 %v141_v6, %v141_v6  ;;  %v127_v55 = vmul.f32 1.4142135, %v285_v49 }
  0xad   :  { %223 = vst.msk [vmem:[%s521_s1 + $0x14] sm:$0xf] %vm217_vm1, %v259_v50  ;;  %v144_v8 = vmul.f32 %v128_v51, %v361_v16  ;;  %298 = vrsqrt.f32 %v104_v52 }
  0xae   :  { %v287_v56 = vpop.eup %286  ;;  %222 = vst.msk [vmem:[%s521_s1 + $0x10] sm:$0xf] %vm217_vm1, %v258_v54  ;;  %v143_v9 = vmul.f32 %v127_v55, %v366_v17  ;;  %300 = vrsqrt.f32 %v103_v53 }
  0xaf   :  { %v289_v57 = vpop.eup %288  ;;  %v261_v58 = vpack.c.bf16 %v144_v8, %v144_v8  ;;  %v130_v59 = vmul.f32 1.4142135, %v287_v56 }
  0xb0   :  { %v260_v60 = vpack.c.bf16 %v143_v9, %v143_v9  ;;  %v129_v61 = vmul.f32 1.4142135, %v289_v57 }
  0xb1   :  { %225 = vst.msk [vmem:[%s521_s1 + $0x1c] sm:$0xf] %vm217_vm1, %v261_v58  ;;  %v146_v16 = vmul.f32 %v130_v59, %v377_v22 }
  0xb2   :  { %v291_v62 = vpop.eup %290  ;;  %224 = vst.msk [vmem:[%s521_s1 + $0x18] sm:$0xf] %vm217_vm1, %v260_v60  ;;  %v145_v17 = vmul.f32 %v129_v61, %v382_v23 }
  0xb3   :  { %v293_v63 = vpop.eup %292  ;;  %v263_v3 = vpack.c.bf16 %v146_v16, %v146_v16  ;;  %v132_v4 = vmul.f32 1.4142135, %v291_v62 }
  0xb4   :  { %v262_v5 = vpack.c.bf16 %v145_v17, %v145_v17  ;;  %v131_v7 = vmul.f32 1.4142135, %v293_v63 }
  0xb5   :  { %227 = vst.msk [vmem:[%s521_s1 + $0x24] sm:$0xf] %vm217_vm1, %v263_v3  ;;  %v148_v22 = vmul.f32 %v132_v4, %v393_v28 }
  0xb6   :  { %v295_v10 = vpop.eup %294  ;;  %226 = vst.msk [vmem:[%s521_s1 + $0x20] sm:$0xf] %vm217_vm1, %v262_v5  ;;  %v147_v23 = vmul.f32 %v131_v7, %v398_v29 }
  0xb7   :  { %v297_v11 = vpop.eup %296  ;;  %v265_v12 = vpack.c.bf16 %v148_v22, %v148_v22  ;;  %v134_v13 = vmul.f32 1.4142135, %v295_v10 }
  0xb8   :  { %v264_v14 = vpack.c.bf16 %v147_v23, %v147_v23  ;;  %v133_v15 = vmul.f32 1.4142135, %v297_v11 }
  0xb9   :  { %229 = vst.msk [vmem:[%s521_s1 + $0x2c] sm:$0xf] %vm217_vm1, %v265_v12  ;;  %v150_v28 = vmul.f32 %v134_v13, %v409_v34 }
  0xba   :  { %v299_v18 = vpop.eup %298  ;;  %228 = vst.msk [vmem:[%s521_s1 + $0x28] sm:$0xf] %vm217_vm1, %v264_v14  ;;  %v149_v29 = vmul.f32 %v133_v15, %v414_v35 }
  0xbb   :  { %v301_v19 = vpop.eup %300  ;;  %v267_v20 = vpack.c.bf16 %v150_v28, %v150_v28  ;;  %v136_v21 = vmul.f32 1.4142135, %v299_v18 }
  0xbc   :  { %v266_v24 = vpack.c.bf16 %v149_v29, %v149_v29  ;;  %v135_v25 = vmul.f32 1.4142135, %v301_v19 }
  0xbd   :  { %231 = vst.msk [vmem:[%s521_s1 + $0x34] sm:$0xf] %vm217_vm1, %v267_v20  ;;  %v152_v34 = vmul.f32 %v136_v21, %v425_v40 }
  0xbe   :  { %230 = vst.msk [vmem:[%s521_s1 + $0x30] sm:$0xf] %vm217_vm1, %v266_v24  ;;  %v151_v26 = vmul.f32 %v135_v25, %v430_v41 }
  0xbf   :  { %v269_v35 = vpack.c.bf16 %v152_v34, %v152_v34 }
  0xc0   :  { %v268_v27 = vpack.c.bf16 %v151_v26, %v151_v26 }
  0xc1   :  { %233 = vst.msk [vmem:[%s521_s1 + $0x3c] sm:$0xf] %vm217_vm1, %v269_v35 }
  0xc2   :  { %232 = vst.msk [vmem:[%s521_s1 + $0x38] sm:$0xf] %vm217_vm1, %v268_v27 }

</bundles_post_ra>
